<compile_context>
chip_gen: v7x
topology: tpu7x:2x2x1
jax: 0.10.0
libtpu: 0.0.40
codegen_flags: <defaults>
</compile_context>

<pallas_src>
import jax
import jax.numpy as jnp
from jax import lax
from jax.experimental import pallas as pl
from jax.experimental.pallas import tpu as pltpu

EPS = 1e-5


def _cdiv(a, b):
    return -(-a // b)


def _round_up(a, b):
    return _cdiv(a, b) * b


def _tensorcores_per_chip():
    """Best-effort TensorCores-per-chip: 2 on v7x, else 1 (v5e / v6e)."""
    try:
        kind = jax.devices()[0].device_kind.lower()
        if "v7" in kind:
            return 2
    except Exception:
        pass
    return 1


def basic_block_kernel(x_ref, w_ref, b_ref, o_ref):
    # One fused MXU matmul (both conv branches, BN scale pre-folded into w),
    # then combined bias + ReLU.  bf16 operands, f32 accumulation, bf16 store.
    acc = jnp.dot(x_ref[...], w_ref[...], preferred_element_type=jnp.float32)
    o_ref[...] = jnp.maximum(acc + b_ref[...], 0.0).astype(o_ref.dtype)


def fold_bn(gamma, beta, mean, var):
    scale = gamma / jnp.sqrt(var + EPS)
    bias = beta - mean * scale
    return scale.astype(jnp.float32), bias.astype(jnp.float32)


def make_basic_block(params, stride=2, max_block_rows=1024):
    """Folds BN into the conv weights once and returns a jitted forward fn."""
    Cout, Cin = params["w1"].shape[0], params["w1"].shape[1]
    Cskip = params["w2"].shape[1]
    K = 9 * Cin + Cskip

    # ---- fold BN (eval mode) into the conv weights; single combined bias ----
    s1, b1 = fold_bn(params["g1"], params["be1"], params["m1"], params["v1"])
    s2, b2 = fold_bn(params["g2"], params["be2"], params["m2"], params["v2"])
    w1 = jnp.transpose(params["w1"], (2, 3, 1, 0)).reshape(9 * Cin, Cout) * s1[None, :]
    w2 = jnp.transpose(params["w2"], (2, 3, 1, 0)).reshape(Cskip, Cout) * s2[None, :]
    wc = jnp.concatenate([w1, w2], axis=0)          # (K, Cout) f32
    bc = b1 + b2                                    # (Cout,)

    # ---- lane-dense packing: P output pixels per row -> last dim P*Cout=128 ----
    if Cout < 128 and 128 % Cout == 0:
        P = 128 // Cout
    else:
        P = 1   # masked-store fallback: correct but a big perf cliff.
    wbd = jnp.kron(jnp.eye(P, dtype=jnp.float32), wc).astype(jnp.bfloat16)  # (P*K, P*Cout)
    bias = jnp.tile(bc, P).reshape(1, P * Cout).astype(jnp.float32)

    tc = _tensorcores_per_chip()

    def forward(x0_nchw, x1_nchw):
        N, _, H, W = x0_nchw.shape
        Ho = (H + 2 - 3) // stride + 1
        Wo = (W + 2 - 3) // stride + 1
        M = N * Ho * Wo

        # ---- glue (fuses under jit): bf16 FIRST, then NHWC / im2col / subsample
        x0 = jnp.transpose(x0_nchw.astype(jnp.bfloat16), (0, 2, 3, 1))
        x0p = jnp.pad(x0, ((0, 0), (1, 1), (1, 1), (0, 0)))
        cols = [x0p[:, kh:kh + stride * (Ho - 1) + 1:stride,
                       kw:kw + stride * (Wo - 1) + 1:stride, :]
                for kh in range(3) for kw in range(3)]
        patches = jnp.stack(cols, axis=3).reshape(M, 9 * Cin)

        x1 = jnp.transpose(x1_nchw.astype(jnp.bfloat16), (0, 2, 3, 1))
        xs = x1[:, ::stride, ::stride, :].reshape(M, Cskip)
        fused = jnp.concatenate([patches, xs], axis=1)              # bf16 (M, K)

        # ---- row tiling: big blocks, cdiv grid, 16-row (bf16) alignment ----
        rows = _cdiv(M, P)
        n_blocks = max(1, _cdiv(rows, max_block_rows))
        if tc > 1 and rows >= 2 * 16:
            # 2-TC chips: even, equal-sized blocks so both TensorCores get work.
            n_blocks = _round_up(max(n_blocks, tc), tc)
        br = _round_up(_cdiv(rows, n_blocks), 16)
        rows_p = _round_up(rows, br)
        Mp = rows_p * P
        if Mp != M:
            fused = jnp.pad(fused, ((0, Mp - M), (0, 0)))
        packed = fused.reshape(rows_p, P * K)
        grid = (rows_p // br,)

        out_packed = pl.pallas_call(
            basic_block_kernel,
            out_shape=jax.ShapeDtypeStruct((rows_p, P * Cout), jnp.bfloat16),
            grid_spec=pltpu.PrefetchScalarGridSpec(
                num_scalar_prefetch=0,
                grid=grid,
                in_specs=[
                    pl.BlockSpec((br, P * K), lambda i: (i, 0)),        # packed pixels
                    pl.BlockSpec((P * K, P * Cout), lambda i: (0, 0)),  # block-diag weight
                    pl.BlockSpec((1, P * Cout), lambda i: (0, 0)),      # combined bias
                ],
                out_specs=pl.BlockSpec((br, P * Cout), lambda i: (i, 0)),
            ),
            compiler_params=pltpu.CompilerParams(
                dimension_semantics=("parallel",),
                allow_input_fusion=[True, False, False],
            ),
        )(packed, wbd, bias)

        # Padded rows hold ReLU(bias) != 0; the [:M] slice drops them.
        out = out_packed.reshape(rows_p * P, Cout)[:M].reshape(N, Ho, Wo, Cout)
        out = jnp.transpose(out, (0, 3, 1, 2))          # NCHW, still bf16
        return out.astype(jnp.float32)                  # PyTorch interface dtype

    return jax.jit(forward)


def reference_forward(x0, x1, params, stride=2):
    """Pure-JAX NCHW f32 reference (mirrors the PyTorch forward in eval mode)."""
    def bn(y, g, be, m, v):
        return (y - m[None, :, None, None]) / jnp.sqrt(v[None, :, None, None] + EPS) \
               * g[None, :, None, None] + be[None, :, None, None]
    r = lax.conv_general_dilated(x0, params["w1"], (stride, stride),
                                 ((1, 1), (1, 1)),
                                 dimension_numbers=("NCHW", "OIHW", "NCHW"))
    r = bn(r, params["g1"], params["be1"], params["m1"], params["v1"])
    s = lax.conv_general_dilated(x1, params["w2"], (stride, stride),
                                 ((0, 0), (0, 0)),
                                 dimension_numbers=("NCHW", "OIHW", "NCHW"))
    s = bn(s, params["g2"], params["be2"], params["m2"], params["v2"])
    return jnp.maximum(r + s, 0.0)


if __name__ == "__main__":
    key = jax.random.PRNGKey(0)
    k = jax.random.split(key, 12)

    N, Cin, H, W = 2, 4, 16, 16
    Cout, Cskip, stride = 8, 4, 2

    # inputs: x is the tuple (x[0], x[1]) from the PyTorch forward
    x0 = jax.random.normal(k[0], (N, Cin, H, W), jnp.float32)
    x1 = jax.random.normal(k[1], (N, Cskip, H, W), jnp.float32)

    # deterministic parameter init (no checkpoint loading)
    params = {
        "w1": 0.1 * jax.random.normal(k[2], (Cout, Cin, 3, 3), jnp.float32),
        "w2": 0.1 * jax.random.normal(k[3], (Cout, Cskip, 1, 1), jnp.float32),
        "g1": 1.0 + 0.1 * jax.random.normal(k[4], (Cout,), jnp.float32),
        "be1": 0.1 * jax.random.normal(k[5], (Cout,), jnp.float32),
        "m1": 0.1 * jax.random.normal(k[6], (Cout,), jnp.float32),
        "v1": 0.5 + jnp.abs(jax.random.normal(k[7], (Cout,), jnp.float32)),
        "g2": 1.0 + 0.1 * jax.random.normal(k[8], (Cout,), jnp.float32),
        "be2": 0.1 * jax.random.normal(k[9], (Cout,), jnp.float32),
        "m2": 0.1 * jax.random.normal(k[10], (Cout,), jnp.float32),
        "v2": 0.5 + jnp.abs(jax.random.normal(k[11], (Cout,), jnp.float32)),
    }

    fwd = make_basic_block(params, stride=stride)
    out = jax.block_until_ready(fwd(x0, x1))

    ref = reference_forward(x0, x1, params, stride=stride)
    assert out.shape == (N, Cout, H // stride, W // stride), out.shape
    # bf16 operands + bf16 result (f32 MXU accumulation) vs. f32 reference
    # -> correspondingly loosened tolerance.
    assert jnp.allclose(out, ref, atol=5e-2, rtol=5e-2), \
        f"max err {jnp.max(jnp.abs(out - ref))}"

    print("KERNEL_OK")
</pallas_src>

<mosaic_0001>
module attributes {stable_mosaic.version = 11 : i64} {
  func.func @basic_block_kernel(%arg0: i32, %arg1: memref<16x640xbf16, #tpu.memory_space<vmem>>, %arg2: memref<640x128xbf16, #tpu.memory_space<vmem>>, %arg3: memref<1x128xf32, #tpu.memory_space<vmem>>, %arg4: memref<16x128xbf16, #tpu.memory_space<vmem>>) attributes {dimension_semantics = [#tpu.dimension_semantics<parallel>], iteration_bounds = array<i64: 1>, scalar_prefetch = 0 : i64, scratch_operands = 0 : i64, tpu.core_type = #tpu.core_type<tc>, window_params = [{transform_indices = @transform_0, window_bounds = array<i64: 16, 640>}, {pipeline_mode = #tpu.pipeline_mode<synchronous>, transform_indices = @transform_1, window_bounds = array<i64: 640, 128>}, {pipeline_mode = #tpu.pipeline_mode<synchronous>, transform_indices = @transform_2, window_bounds = array<i64: 1, 128>}, {transform_indices = @transform_3, window_bounds = array<i64: 16, 128>}]} {
    %c0 = arith.constant 0 : index
    %c0_0 = arith.constant 0 : index
    %0 = vector.load %arg1[%c0, %c0_0] : memref<16x640xbf16, #tpu.memory_space<vmem>>, vector<16x640xbf16>
    %c0_1 = arith.constant 0 : index
    %c0_2 = arith.constant 0 : index
    %1 = vector.load %arg2[%c0_1, %c0_2] : memref<640x128xbf16, #tpu.memory_space<vmem>>, vector<640x128xbf16>
    %cst = arith.constant dense<0.000000e+00> : vector<16x128xf32>
    %2 = tpu.matmul %0, %1, %cst {dimension_numbers = #tpu.dot_dimension_numbers<[1], [0], [0], [1], [0, 0, 1, 1], [], []>} : vector<16x640xbf16>, vector<640x128xbf16>, vector<16x128xf32> -> vector<16x128xf32>
    %c0_3 = arith.constant 0 : index
    %c0_4 = arith.constant 0 : index
    %3 = vector.load %arg3[%c0_3, %c0_4] : memref<1x128xf32, #tpu.memory_space<vmem>>, vector<1x128xf32>
    %4 = vector.broadcast %3 : vector<1x128xf32> to vector<16x128xf32>
    %5 = arith.addf %2, %4 : vector<16x128xf32>
    %cst_5 = arith.constant 0.000000e+00 : f32
    %6 = vector.broadcast %cst_5 : f32 to vector<16x128xf32>
    %7 = arith.maximumf %5, %6 : vector<16x128xf32>
    %8 = arith.truncf %7 : vector<16x128xf32> to vector<16x128xbf16>
    %c0_6 = arith.constant 0 : index
    %c0_7 = arith.constant 0 : index
    %9 = vector.load %arg4[%c0_6, %c0_7] : memref<16x128xbf16, #tpu.memory_space<vmem>>, vector<16x128xbf16>
    tpu.vector_store %arg4[%c0_6, %c0_7], %8 {strides = array<i32>} : memref<16x128xbf16, #tpu.memory_space<vmem>>, vector<16x128xbf16>,
    return
  }
  func.func @transform_0(%arg0: i32) -> (i32, i32) {
    %c0_i32 = arith.constant 0 : i32
    %c0_i32_0 = arith.constant 0 : i32
    return %arg0, %c0_i32 : i32, i32
  }
  func.func @transform_1(%arg0: i32) -> (i32, i32) {
    %c0_i32 = arith.constant 0 : i32
    %c0_i32_0 = arith.constant 0 : i32
    %c0_i32_1 = arith.constant 0 : i32
    return %c0_i32, %c0_i32_0 : i32, i32
  }
  func.func @transform_2(%arg0: i32) -> (i32, i32) {
    %c0_i32 = arith.constant 0 : i32
    %c0_i32_0 = arith.constant 0 : i32
    %c0_i32_1 = arith.constant 0 : i32
    return %c0_i32, %c0_i32_0 : i32, i32
  }
  func.func @transform_3(%arg0: i32) -> (i32, i32) {
    %c0_i32 = arith.constant 0 : i32
    %c0_i32_0 = arith.constant 0 : i32
    return %arg0, %c0_i32 : i32, i32
  }
}

</mosaic_0001>

<bundles_post_ra>
// kernel: forward.1
= control target key start
LH: loop header
LB: loop body
LE: loop exit
PB: predicated region body
PF: predicated region fallthrough
CT: control target
= control target key end

     0   :  { %v690_v33 = vmov 0.0   ;;  %vm691_vm0 = vmmov 0   ;;  %s853_s1 = inlined_call_operand.vmem [shape: bf16[640,128], index: 1, kind: input, shape index: {}]   ;;  %s854_s0 = inlined_call_operand.vmem [shape: bf16[16,640], index: 0, kind: input, shape index: {}]   ;;  %s855_s2 = inlined_call_operand.vmem [shape: f32[1,128], index: 2, kind: input, shape index: {}]   ;;  %s856_s3 = inlined_call_operand.vmem [shape: bf16[16,128], index: 3, kind: output, shape index: {}]  }
   0x1   :  { %v643_v0 = vld [vmem:[%s853_s1 + $0x40] sm:$0xff]   ;;  %v647_v4 = vld [vmem:[%s853_s1 + $0x48] sm:$0xff]   ;;  %v651_v8 = vld [vmem:[%s853_s1 + $0x50] sm:$0xff]  }
   0x2   :  { %v644_v1 = vld [vmem:[%s853_s1] sm:$0xff]   ;;  %568 = vmatprep.subr.bf16.mxu0 %v643_v0  ;;  %v648_v5 = vld [vmem:[%s853_s1 + $0x8] sm:$0xff]   ;;  %v652_v9 = vld [vmem:[%s853_s1 + $0x10] sm:$0xff]  }
   0x3   :  { %v645_v2 = vld [vmem:[%s853_s1 + $0xc0] sm:$0xff]   ;;  %569 = vmatpush3.bf16.msra.mxu0 %v644_v1  ;;  %v649_v6 = vld [vmem:[%s853_s1 + $0xc8] sm:$0xff]   ;;  %v653_v10 = vld [vmem:[%s853_s1 + $0xd0] sm:$0xff]  }
   0x4   :  { %v646_v3 = vld [vmem:[%s853_s1 + $0x80] sm:$0xff]   ;;  %590 = vmatprep.subr.bf16.mxu1 %v645_v2  ;;  %570 = vmatprep.subr.bf16.mxu0 %v647_v4  ;;  %v650_v7 = vld [vmem:[%s853_s1 + $0x88] sm:$0xff]   ;;  %v654_v11 = vld [vmem:[%s853_s1 + $0x90] sm:$0xff]  }
   0x5   :  { %591 = vmatpush3.bf16.msra.mxu1 %v646_v3  ;;  %v655_v12 = vld [vmem:[%s853_s1 + $0x58] sm:$0xff]   ;;  %v659_v16 = vld [vmem:[%s853_s1 + $0x60] sm:$0xff]   ;;  %v663_v20 = vld [vmem:[%s853_s1 + $0x68] sm:$0xff]  }
   0x6   :  { %592 = vmatprep.subr.bf16.mxu1 %v649_v6  ;;  %v656_v13 = vld [vmem:[%s853_s1 + $0x18] sm:$0xff]   ;;  %v660_v17 = vld [vmem:[%s853_s1 + $0x20] sm:$0xff]   ;;  %v664_v21 = vld [vmem:[%s853_s1 + $0x28] sm:$0xff]  }
   0x7   :  { %571 = vmatpush3.bf16.msra.mxu0 %v648_v5  ;;  %v657_v14 = vld [vmem:[%s853_s1 + $0xd8] sm:$0xff]   ;;  %v661_v18 = vld [vmem:[%s853_s1 + $0xe0] sm:$0xff]   ;;  %v665_v22 = vld [vmem:[%s853_s1 + $0xe8] sm:$0xff]  }
   0x8   :  { %572 = vmatprep.subr.bf16.mxu0 %v651_v8  ;;  %v658_v15 = vld [vmem:[%s853_s1 + $0x98] sm:$0xff]   ;;  %v662_v19 = vld [vmem:[%s853_s1 + $0xa0] sm:$0xff]   ;;  %v666_v23 = vld [vmem:[%s853_s1 + $0xa8] sm:$0xff]  }
   0x9   :  { %593 = vmatpush3.bf16.msra.mxu1 %v650_v7  ;;  %v667_v24 = vld [vmem:[%s853_s1 + $0x70] sm:$0xff]   ;;  %v671_v28 = vld [vmem:[%s853_s1 + $0x78] sm:$0xff]   ;;  %v680_v36 = vld [vmem:[%s854_s0 + $0xc] ss:$20 sps:$4 sm:$0xff]  }
   0xa   :  { %594 = vmatprep.subr.bf16.mxu1 %v653_v10  ;;  %v668_v25 = vld [vmem:[%s853_s1 + $0x30] sm:$0xff]   ;;  %v672_v29 = vld [vmem:[%s853_s1 + $0x38] sm:$0xff]   ;;  %v681_v37 = vld [vmem:[%s853_s1 + $0x100] sm:$0xff]   ;;  %447 = vmatprep.mubr.bf16.mxu1 %v680_v36 }
   0xb   :  { %573 = vmatpush3.bf16.msra.mxu0 %v652_v9  ;;  %v669_v26 = vld [vmem:[%s853_s1 + $0xf0] sm:$0xff]   ;;  %v673_v30 = vld [vmem:[%s853_s1 + $0xf8] sm:$0xff]   ;;  %v682_v38 = vld [vmem:[%s853_s1 + $0x108] sm:$0xff]  }
   0xc   :  { %574 = vmatprep.subr.bf16.mxu0 %v655_v12  ;;  %v670_v27 = vld [vmem:[%s853_s1 + $0xb0] sm:$0xff]   ;;  %v676_v32 = vld [vmem:[%s854_s0 + $0x4] ss:$20 sps:$4 sm:$0xff]   ;;  %v678_v35 = vld [vmem:[%s854_s0 + $0x8] ss:$20 sps:$4 sm:$0xff]  }
   0xd   :  { %595 = vmatpush3.bf16.msra.mxu1 %v654_v11  ;;  %v674_v31 = vld [vmem:[%s854_s0] ss:$20 sps:$4 sm:$0xff]   ;;  %v677_v34 = vld [vmem:[%s853_s1 + $0xb8] sm:$0xff]   ;;  %406 = vmatprep.mubr.bf16.mxu0 %v676_v32  ;;  %v686_v42 = vld [vmem:[%s853_s1 + $0x128] sm:$0xff]  }
   0xe   :  { %596 = vmatprep.subr.bf16.mxu1 %v657_v14  ;;  %v683_v39 = vld [vmem:[%s853_s1 + $0x110] sm:$0xff]   ;;  %v684_v40 = vld [vmem:[%s853_s1 + $0x118] sm:$0xff]   ;;  %v685_v41 = vld [vmem:[%s853_s1 + $0x120] sm:$0xff]  }
   0xf   :  { %575 = vmatpush3.bf16.msra.mxu0 %v656_v13  ;;  %v687_v43 = vld [vmem:[%s853_s1 + $0x130] sm:$0xff]   ;;  %v688_v44 = vld [vmem:[%s853_s1 + $0x138] sm:$0xff]   ;;  %v513_v47 = vld [vmem:[%s855_s2] ss:$0 sm:$0xff] }
  0x10   :  { %576 = vmatprep.subr.bf16.mxu0 %v659_v16  ;;  %v689_v45 = vld [vmem:[%s854_s0 + $0x10] ss:$20 sps:$4 sm:$0xff]  }
  0x11   :  { %597 = vmatpush3.bf16.msra.mxu1 %v658_v15 }
  0x12   :  { %598 = vmatprep.subr.bf16.mxu1 %v661_v18 }
  0x13   :  { %577 = vmatpush3.bf16.msra.mxu0 %v660_v17 }
  0x14   :  { %578 = vmatprep.subr.bf16.mxu0 %v663_v20 }
  0x15   :  { %599 = vmatpush3.bf16.msra.mxu1 %v662_v19 }
  0x16   :  { %600 = vmatprep.subr.bf16.mxu1 %v665_v22 }
  0x17   :  { %579 = vmatpush3.bf16.msra.mxu0 %v664_v21 }
  0x18   :  { %580 = vmatprep.subr.bf16.mxu0 %v667_v24 }
  0x19   :  { %601 = vmatpush3.bf16.msra.mxu1 %v666_v23 }
  0x1a   :  { %602 = vmatprep.subr.bf16.mxu1 %v669_v26 }
  0x1b   :  { %581 = vmatpush3.bf16.msra.mxu0 %v668_v25 }
  0x1c   :  { %582 = vmatprep.subr.bf16.mxu0 %v671_v28 }
  0x1d   :  { %603 = vmatpush3.bf16.msra.mxu1 %v670_v27 }
  0x1e   :  { %604 = vmatprep.subr.bf16.mxu1 %v673_v30 }
  0x1f   :  { %583 = vmatpush3.bf16.msra.mxu0 %v672_v29 }
  0x20   :  { %621 = vmatprep.subr.bf16.mxu0 %v690_v33 }
  0x21   :  { %605 = vmatpush3.bf16.msra.mxu1 %v677_v34 }
  0x22   :  { %407 = vmatmul.mubr.bf16.vlgmr.msra.gmra.mrb[0].mxu0 %v674_v31 }
  0x23   :  { %637 = vmatprep.mubr.msk.bf16.mxu0 %vm691_vm0, %v690_v33  ;;  %622 = vmatpush3.bf16.msra.mxu0 %v681_v37 }
  0x24   :  { %448 = vmatmul.mubr.bf16.vlgmr.msra.gmra.mrb[0].mxu1 %v678_v35  ;;  %623 = vmatprep.subr.bf16.mxu0 %v690_v33 }
  0x27   :  { %624 = vmatpush3.bf16.msra.mxu0 %v682_v38 }
  0x28   :  { %625 = vmatprep.subr.bf16.mxu0 %v690_v33 }
  0x2b   :  { %626 = vmatpush3.bf16.msra.mxu0 %v683_v39 }
  0x2c   :  { %627 = vmatprep.subr.bf16.mxu0 %v690_v33 }
  0x2f   :  { %628 = vmatpush3.bf16.msra.mxu0 %v684_v40 }
  0x30   :  { %629 = vmatprep.subr.bf16.mxu0 %v690_v33 }
  0x33   :  { %630 = vmatpush3.bf16.msra.mxu0 %v685_v41 }
  0x34   :  { %631 = vmatprep.subr.bf16.mxu0 %v690_v33 }
  0x37   :  { %632 = vmatpush3.bf16.msra.mxu0 %v686_v42 }
  0x38   :  { %633 = vmatprep.subr.bf16.mxu0 %v690_v33 }
  0x3b   :  { %634 = vmatpush3.bf16.msra.mxu0 %v687_v43 }
  0x3c   :  { %635 = vmatprep.subr.bf16.mxu0 %v690_v33 }
  0x3f   :  { %636 = vmatpush3.bf16.msra.mxu0 %v688_v44 }
  0x42   :  { %638 = vmatmul.mubr.bf16.vlgmr.msra.gmra.mrb[4].mxu0 %v689_v45 }
  0xf5   :  { %v584_v46 = vpop.f32.mrb[0].mxu0 }
  0xf6   :  { %v585_v48 = vpop.f32.mrb[1].mxu0 }
  0xf7   :  { %v586_v49 = vadd.f32 %v585_v48, %v584_v46  ;;  %v587_v50 = vpop.f32.mrb[2].mxu0  ;;  %v606_v51 = vpop.f32.mrb[0].mxu1 }
  0xf8   :  { %v588_v52 = vpop.f32.mrb[3].mxu0  ;;  %v607_v55 = vpop.f32.mrb[1].mxu1 }
  0xf9   :  { %v409_v53 = vadd.f32 %v586_v49, %v513_v47  ;;  %v589_v54 = vadd.f32 %v588_v52, %v587_v50  ;;  %v608_v56 = vadd.f32 %v607_v55, %v606_v51  ;;  %v609_v57 = vpop.f32.mrb[2].mxu1 }
  0xfa   :  { %v610_v59 = vpop.f32.mrb[3].mxu1 }
  0xfb   :  { %v412_v58 = vadd.f32 %v589_v54, %v513_v47  ;;  %v611_v60 = vadd.f32 %v610_v59, %v609_v57  ;;  %v450_v61 = vadd.f32 %v608_v56, %v409_v53 }
  0xfd   :  { %v453_v62 = vadd.f32 %v611_v60, %v412_v58 }
 0x115   :  { %v490_v63 = vpop.f32.mrb[4].mxu0 }
 0x116   :  { %v491_v0 = vadd.f32 %v490_v63, %v450_v61  ;;  %v639_v1 = vpop.f32.mrb[5].mxu0 }
 0x117   :  { %v493_v2 = vpop.f32.mrb[6].mxu0 }
 0x118   :  { %v494_v3 = vadd.f32 %v493_v2, %v453_v62  ;;  %v640_v4 = vpop.f32.mrb[7].mxu0  ;;  %v497_v5 = vmax.f32 %v491_v0, 0.0 }
 0x11a   :  { %v498_v6 = vmax.f32 %v494_v3, 0.0 }
 0x11c   :  { %v566_v7 = vpack.c.bf16 %v498_v6, %v497_v5 }
 0x11e   :  { %567 = vst [vmem:[%s856_s3] sm:$0xff] %v566_v7  }

</bundles_post_ra>
